<compile_context>
chip_gen: v6e
topology: v6e:2x2x1
jax: 0.10.0
libtpu: 0.0.40
codegen_flags: <defaults>
</compile_context>

<pallas_src>
import numpy as np
import jax
import jax.numpy as jnp
from jax.experimental import pallas as pl
from jax.experimental.pallas import tpu as pltpu

NX = 13
NY = 13
N_NODES = NX * NY
BOLTZMANN_CTE = 5.67e-08


def build_matrices(L=0.1, thickness=0.001, board_k=15.0, ir_emmisivity=0.8):
    """Build dense K (169x169, node-major, matches the torch sparse K) and
    sigma_e = BOLTZMANN_CTE * diag(E) as an (n, 1) column."""
    interfaces = [0, NX - 1, NX * NX - 1, NX * NX - NX]
    dx = L / (NX - 1)
    dy = L / (NY - 1)
    GLx = thickness * board_k * dy / dx
    GLy = thickness * board_k * dx / dy
    GR = 2 * dx * dy * ir_emmisivity

    K = np.zeros((N_NODES, N_NODES), dtype=np.float32)
    for j in range(NY):
        for i in range(NX):
            idx = i + NX * j
            if idx in interfaces:
                K[idx, idx] += 1.0
            else:
                GLii = 0.0
                if i + 1 < NX:
                    K[idx, idx + 1] += -GLx
                    GLii += GLx
                if i - 1 >= 0:
                    K[idx, idx - 1] += -GLx
                    GLii += GLx
                if j + 1 < NY:
                    K[idx, idx + NX] += -GLy
                    GLii += GLy
                if j - 1 >= 0:
                    K[idx, idx - NX] += -GLy
                    GLii += GLy
                K[idx, idx] += GLii

    sigma_e = np.zeros((N_NODES, 1), dtype=np.float32)
    for idx in range(N_NODES):
        if idx not in interfaces:
            sigma_e[idx, 0] = BOLTZMANN_CTE * GR

    return jnp.asarray(K), jnp.asarray(sigma_e)


def _energy_kernel(k_ref, se_ref, t_ref, tenv_ref, q_ref, out_ref, acc_ref):
    b = pl.program_id(1)

    @pl.when(b == 0)
    def _init():
        acc_ref[...] = jnp.zeros_like(acc_ref)

    T = t_ref[...]          # (n, Bt) node-major: batch is the lane axis (lane-dense)
    Tenv = tenv_ref[...]    # (n, Bt)

    # Conduction on the MXU: (n, n) @ (n, Bt); K stays resident in VMEM.
    cond = jnp.dot(k_ref[...], T, preferred_element_type=jnp.float32)

    # Radiation: sigma_e (n, 1) already includes the Boltzmann constant.
    t2 = T * T
    e2 = Tenv * Tenv
    excess = cond + se_ref[...] * (t2 * t2 - e2 * e2) - q_ref[...]

    # Steady state: sublane reduce only; cross-lane reduce + store deferred to the end.
    acc_ref[...] += jnp.sum(jnp.abs(excess), axis=0, keepdims=True)

    @pl.when(b == pl.num_programs(1) - 1)
    def _fin():
        out_ref[...] = jnp.broadcast_to(jnp.sum(acc_ref[...]), out_ref.shape)


def _cdiv(a, b):
    return (a + b - 1) // b


def _round_up(x, m):
    return _cdiv(x, m) * m


def la_energia_no_aparece(outputs, heaters, interfaces, Tenv, K, sigma_e,
                          *, batch_tile=2048, num_cores=2):
    """JAX/Pallas equivalent of LaEnergiaNoAparece.forward.

    outputs / heaters / interfaces: node-major (n_nodes, ...) flattened to (n_nodes, B).
    Tenv: (B, n_nodes) -- transposed once (as the torch code does).
    """
    n = K.shape[0]

    # torch.flatten(..., start_dim=1): already node-major, no transposes needed.
    T = outputs.reshape(outputs.shape[0], -1).astype(jnp.float32)            # (n, B)
    Q = (heaters.reshape(heaters.shape[0], -1)
         + interfaces.reshape(interfaces.shape[0], -1)).astype(jnp.float32)  # (n, B) fused
    Tenv_t = jnp.transpose(Tenv.astype(jnp.float32), (1, 0))                 # (n, B)

    B = T.shape[1]

    # Adaptive tiling: at least one tile per core, tile count a multiple of
    # num_cores, zero-pad tail bounded by < 128 columns.
    nt = _round_up(max(num_cores, _cdiv(B, max(batch_tile, 128))), num_cores)
    Bt = _round_up(_cdiv(B, nt), 128)
    B_pad = nt * Bt
    if B_pad != B:
        pad = ((0, 0), (0, B_pad - B))
        # All-zero padded columns give |K@0 + sigma*(0-0) - 0| = 0, so the sum is exact
        # (Tenv must be zero-padded in the same columns -- it is).
        T = jnp.pad(T, pad)
        Tenv_t = jnp.pad(Tenv_t, pad)
        Q = jnp.pad(Q, pad)
    tiles_per_core = nt // num_cores

    stream_map = lambda c, b: (0, c * tiles_per_core + b)

    grid_spec = pltpu.PrefetchScalarGridSpec(
        num_scalar_prefetch=0,
        grid=(num_cores, tiles_per_core),
        in_specs=[
            pl.BlockSpec((n, n), lambda c, b: (0, 0)),   # K, resident in VMEM
            pl.BlockSpec((n, 1), lambda c, b: (0, 0)),   # sigma_e column, resident
            pl.BlockSpec((n, Bt), stream_map),           # T
            pl.BlockSpec((n, Bt), stream_map),           # Tenv (transposed)
            pl.BlockSpec((n, Bt), stream_map),           # Q = heaters + interfaces
        ],
        out_specs=pl.BlockSpec((8, 128), lambda c, b: (c, 0)),  # per-core partial block
        scratch_shapes=[pltpu.VMEM((1, Bt), jnp.float32)],
    )

    partials = pl.pallas_call(
        _energy_kernel,
        out_shape=jax.ShapeDtypeStruct((num_cores * 8, 128), jnp.float32),
        grid_spec=grid_spec,
        compiler_params=pltpu.CompilerParams(
            dimension_semantics=("parallel", "arbitrary"),
            vmem_limit_bytes=48 * 1024 * 1024),
    )(K, sigma_e, T, Tenv_t, Q)

    # Each core's (8,128) block is filled with its scalar partial sum; take one copy each.
    per_core = partials.reshape(num_cores, 8, 128)[:, 0, 0]
    return jnp.sum(per_core) / jnp.float32(n * B)


def _reference(outputs, heaters, interfaces, Tenv, K, sigma_e):
    """Pure-JAX reference mirroring the torch forward (node-major)."""
    heaters = heaters.reshape(heaters.shape[0], -1)
    interfaces = interfaces.reshape(interfaces.shape[0], -1)
    Q = heaters + interfaces
    T = outputs.reshape(outputs.shape[0], -1)
    Tenv_t = jnp.transpose(Tenv, (1, 0))
    excess = K @ T + sigma_e * (T ** 4 - Tenv_t ** 4) - Q
    return jnp.mean(jnp.abs(excess))


if __name__ == "__main__":
    key = jax.random.PRNGKey(0)
    K, sigma_e = build_matrices()

    # Case 1: tiny batch (B=8). Case 2: B=1000 with a small batch_tile to exercise
    # multiple tiles per core on the "arbitrary" axis plus the zero-padded tail.
    for B, bt in ((8, 2048), (1000, 128)):
        k1, k2, k3, k4 = jax.random.split(jax.random.fold_in(key, B), 4)
        outputs = 280.0 + 40.0 * jax.random.uniform(k1, (N_NODES, B), dtype=jnp.float32)
        heaters = 0.1 * jax.random.uniform(k2, (N_NODES, B), dtype=jnp.float32)
        interfaces_q = 0.05 * jax.random.uniform(k3, (N_NODES, B), dtype=jnp.float32)
        Tenv = 250.0 + 20.0 * jax.random.uniform(k4, (B, N_NODES), dtype=jnp.float32)

        loss = la_energia_no_aparece(outputs, heaters, interfaces_q, Tenv, K, sigma_e,
                                     batch_tile=bt)
        loss = jax.block_until_ready(loss)

        ref = _reference(outputs, heaters, interfaces_q, Tenv, K, sigma_e)
        np.testing.assert_allclose(np.asarray(loss), np.asarray(ref),
                                   rtol=2e-3, atol=1e-5)

    print("KERNEL_OK")
</pallas_src>

<mosaic_0001>
module attributes {stable_mosaic.version = 11 : i64} {
  func.func @_energy_kernel(%arg0: i32, %arg1: i32, %arg2: memref<169x169xf32, #tpu.memory_space<vmem>>, %arg3: memref<169x1xf32, #tpu.memory_space<vmem>>, %arg4: memref<169x128xf32, #tpu.memory_space<vmem>>, %arg5: memref<169x128xf32, #tpu.memory_space<vmem>>, %arg6: memref<169x128xf32, #tpu.memory_space<vmem>>, %arg7: memref<8x128xf32, #tpu.memory_space<vmem>>, %arg8: memref<1x128xf32, #tpu.memory_space<vmem>>) attributes {dimension_semantics = [#tpu.dimension_semantics<parallel>, #tpu.dimension_semantics<arbitrary>], iteration_bounds = array<i64: 2, 1>, scalar_prefetch = 0 : i64, scratch_operands = 1 : i64, tpu.core_type = #tpu.core_type<tc>, window_params = [{pipeline_mode = #tpu.pipeline_mode<synchronous>, transform_indices = @transform_0, window_bounds = array<i64: 169, 169>}, {pipeline_mode = #tpu.pipeline_mode<synchronous>, transform_indices = @transform_1, window_bounds = array<i64: 169, 1>}, {transform_indices = @transform_2, window_bounds = array<i64: 169, 128>}, {transform_indices = @transform_3, window_bounds = array<i64: 169, 128>}, {transform_indices = @transform_4, window_bounds = array<i64: 169, 128>}, {transform_indices = @transform_5, window_bounds = array<i64: 8, 128>}]} {
    %c0_i32 = arith.constant 0 : i32
    %0 = arith.cmpi eq, %arg1, %c0_i32 : i32
    %1 = arith.extui %0 : i1 to i32
    %c0_i32_0 = arith.constant 0 : i32
    %2 = arith.cmpi ne, %1, %c0_i32_0 : i32
    scf.if %2 {
      %cst_17 = arith.constant 0.000000e+00 : f32
      %27 = vector.broadcast %cst_17 : f32 to vector<1x128xf32>
      %c0_18 = arith.constant 0 : index
      %c0_19 = arith.constant 0 : index
      %28 = vector.load %arg8[%c0_18, %c0_19] : memref<1x128xf32, #tpu.memory_space<vmem>>, vector<1x128xf32>
      tpu.vector_store %arg8[%c0_18, %c0_19], %27 {strides = array<i32>} : memref<1x128xf32, #tpu.memory_space<vmem>>, vector<1x128xf32>,
    } else {
    }
    %c0 = arith.constant 0 : index
    %c0_1 = arith.constant 0 : index
    %3 = vector.load %arg4[%c0, %c0_1] : memref<169x128xf32, #tpu.memory_space<vmem>>, vector<169x128xf32>
    %c0_2 = arith.constant 0 : index
    %c0_3 = arith.constant 0 : index
    %4 = vector.load %arg5[%c0_2, %c0_3] : memref<169x128xf32, #tpu.memory_space<vmem>>, vector<169x128xf32>
    %c0_4 = arith.constant 0 : index
    %c0_5 = arith.constant 0 : index
    %5 = vector.load %arg2[%c0_4, %c0_5] : memref<169x169xf32, #tpu.memory_space<vmem>>, vector<169x169xf32>
    %cst = arith.constant dense<0.000000e+00> : vector<169x128xf32>
    %6 = tpu.matmul %5, %3, %cst {dimension_numbers = #tpu.dot_dimension_numbers<[1], [0], [0], [1], [0, 0, 1, 1], [], []>} : vector<169x169xf32>, vector<169x128xf32>, vector<169x128xf32> -> vector<169x128xf32>
    %7 = arith.mulf %3, %3 : vector<169x128xf32>
    %8 = arith.mulf %4, %4 : vector<169x128xf32>
    %c0_6 = arith.constant 0 : index
    %c0_7 = arith.constant 0 : index
    %9 = vector.load %arg3[%c0_6, %c0_7] : memref<169x1xf32, #tpu.memory_space<vmem>>, vector<169x1xf32>
    %10 = arith.mulf %7, %7 : vector<169x128xf32>
    %11 = arith.mulf %8, %8 : vector<169x128xf32>
    %12 = arith.subf %10, %11 : vector<169x128xf32>
    %13 = vector.broadcast %9 : vector<169x1xf32> to vector<169x128xf32>
    %14 = arith.mulf %13, %12 : vector<169x128xf32>
    %15 = arith.addf %6, %14 : vector<169x128xf32>
    %c0_8 = arith.constant 0 : index
    %c0_9 = arith.constant 0 : index
    %16 = vector.load %arg6[%c0_8, %c0_9] : memref<169x128xf32, #tpu.memory_space<vmem>>, vector<169x128xf32>
    %17 = arith.subf %15, %16 : vector<169x128xf32>
    %c0_10 = arith.constant 0 : index
    %c0_11 = arith.constant 0 : index
    %18 = vector.load %arg8[%c0_10, %c0_11] : memref<1x128xf32, #tpu.memory_space<vmem>>, vector<1x128xf32>
    %19 = math.absf %17 : vector<169x128xf32>
    %cst_12 = arith.constant dense<0.000000e+00> : vector<128xf32>
    %20 = vector.multi_reduction <add>, %19, %cst_12 [0] : vector<169x128xf32> to vector<128xf32>
    %21 = vector.shape_cast %20 : vector<128xf32> to vector<1x128xf32>
    %22 = arith.addf %18, %21 : vector<1x128xf32>
    %c0_13 = arith.constant 0 : index
    %c0_14 = arith.constant 0 : index
    %23 = vector.load %arg8[%c0_13, %c0_14] : memref<1x128xf32, #tpu.memory_space<vmem>>, vector<1x128xf32>
    tpu.vector_store %arg8[%c0_13, %c0_14], %22 {strides = array<i32>} : memref<1x128xf32, #tpu.memory_space<vmem>>, vector<1x128xf32>,
    %c0_i32_15 = arith.constant 0 : i32
    %24 = arith.cmpi eq, %arg1, %c0_i32_15 : i32
    %25 = arith.extui %24 : i1 to i32
    %c0_i32_16 = arith.constant 0 : i32
    %26 = arith.cmpi ne, %25, %c0_i32_16 : i32
    scf.if %26 {
      %c0_17 = arith.constant 0 : index
      %c0_18 = arith.constant 0 : index
      %27 = vector.load %arg8[%c0_17, %c0_18] : memref<1x128xf32, #tpu.memory_space<vmem>>, vector<1x128xf32>
      %28 = vector.shape_cast %27 : vector<1x128xf32> to vector<1x1x128xf32>
      %cst_19 = arith.constant dense<0.000000e+00> : vector<1xf32>
      %29 = vector.multi_reduction <add>, %28, %cst_19 [1, 2] : vector<1x1x128xf32> to vector<1xf32>
      %30 = vector.shape_cast %29 : vector<1xf32> to vector<1x1x1xf32>
      %31 = vector.extract %30[0, 0, 0] : f32 from vector<1x1x1xf32>
      %32 = vector.broadcast %31 : f32 to vector<8x128xf32>
      %c0_20 = arith.constant 0 : index
      %c0_21 = arith.constant 0 : index
      %33 = vector.load %arg7[%c0_20, %c0_21] : memref<8x128xf32, #tpu.memory_space<vmem>>, vector<8x128xf32>
      tpu.vector_store %arg7[%c0_20, %c0_21], %32 {strides = array<i32>} : memref<8x128xf32, #tpu.memory_space<vmem>>, vector<8x128xf32>,
    } else {
    }
    return
  }
  func.func @transform_0(%arg0: i32, %arg1: i32) -> (i32, i32) {
    %c0_i32 = arith.constant 0 : i32
    %c0_i32_0 = arith.constant 0 : i32
    %c0_i32_1 = arith.constant 0 : i32
    return %c0_i32, %c0_i32_0 : i32, i32
  }
  func.func @transform_1(%arg0: i32, %arg1: i32) -> (i32, i32) {
    %c0_i32 = arith.constant 0 : i32
    %c0_i32_0 = arith.constant 0 : i32
    %c0_i32_1 = arith.constant 0 : i32
    return %c0_i32, %c0_i32_0 : i32, i32
  }
  func.func @transform_2(%arg0: i32, %arg1: i32) -> (i32, i32) {
    %c1_i32 = arith.constant 1 : i32
    %0 = arith.muli %arg0, %c1_i32 : i32
    %1 = arith.addi %0, %arg1 : i32
    %c0_i32 = arith.constant 0 : i32
    %c0_i32_0 = arith.constant 0 : i32
    return %c0_i32, %1 : i32, i32
  }
  func.func @transform_3(%arg0: i32, %arg1: i32) -> (i32, i32) {
    %c1_i32 = arith.constant 1 : i32
    %0 = arith.muli %arg0, %c1_i32 : i32
    %1 = arith.addi %0, %arg1 : i32
    %c0_i32 = arith.constant 0 : i32
    %c0_i32_0 = arith.constant 0 : i32
    return %c0_i32, %1 : i32, i32
  }
  func.func @transform_4(%arg0: i32, %arg1: i32) -> (i32, i32) {
    %c1_i32 = arith.constant 1 : i32
    %0 = arith.muli %arg0, %c1_i32 : i32
    %1 = arith.addi %0, %arg1 : i32
    %c0_i32 = arith.constant 0 : i32
    %c0_i32_0 = arith.constant 0 : i32
    return %c0_i32, %1 : i32, i32
  }
  func.func @transform_5(%arg0: i32, %arg1: i32) -> (i32, i32) {
    %c0_i32 = arith.constant 0 : i32
    %c0_i32_0 = arith.constant 0 : i32
    return %arg0, %c0_i32 : i32, i32
  }
}

</mosaic_0001>

<bundles_post_ra>
// kernel: tpu_custom_call.1
= control target key start
LH: loop header
LB: loop body
LE: loop exit
PB: predicated region body
PF: predicated region fallthrough
CT: control target
= control target key end

     0   :  { %s2289_s0 = inlined_call_operand.hbm [shape: f32[169,169], index: 0, kind: input, shape index: {}]   ;;  %s2290_s1 = inlined_call_operand.vmem [shape: f32[169,1], index: 1, kind: input, shape index: {}]   ;;  %s2291_s2 = inlined_call_operand.hbm [shape: f32[169,256], index: 2, kind: input, shape index: {}]   ;;  %s2292_s3 = inlined_call_operand.hbm [shape: f32[169,256], index: 3, kind: input, shape index: {}]   ;;  %s2293_s4 = inlined_call_operand.hbm [shape: f32[169,256], index: 4, kind: input, shape index: {}]   ;;  %s2294_s5 = inlined_call_operand.hbm [shape: f32[16,128], index: 5, kind: output, shape index: {}]  }
   0x1   :  { %2309 = sst [smem:[#allocation21_spill]] %s2291_s2 }
   0x2   :  { %2310 = sst [smem:[#allocation22_spill]] %s2292_s3 }
   0x3   :  { %10 = vsyncpa [#allocation4], 0 }
   0x4   :  { %11 = vsyncpa [#allocation7], 0 }
   0x5   :  { %13 = vsyncpa [#allocation7 + $0x1], 0 }
   0x6   :  { %14 = vsyncpa [#allocation10], 0 }
   0x7   :  { %16 = vsyncpa [#allocation10 + $0x1], 0 }
   0x8   :  { %17 = vsyncpa [#allocation5], 0 }
   0x9   :  { %19 = vsyncpa [#allocation5 + $0x1], 0  ;;  %s1642_s18 = smov 0   ;;  %s1644_s19 = smov 0  }
   0xa   :  { %s1646_s20 = smov 0   ;;  %s1648_s21 = smov 0  }
   0xb   :  { %s1650_s22 = smov 0   ;;  %s1652_s23 = smov 0  }
   0xc LB: > { %2311 = sst [smem:[#allocation16_spill]] %s1595_s22  ;;  %s37_s24 = sadd.s32 1, %s1595_s22  ;;  %s1599_s23 = sphi %s1652_s23, %s25_s23   ;;  %s1595_s22 = sphi %s1650_s22, %s2337_s22   ;;  %s1591_s21 = sphi %s1648_s21, %s2336_s21   ;;  %s1587_s20 = sphi %s1646_s20, %s2340_s20   ;;  %s1583_s19 = sphi %s1644_s19, %s2339_s19   ;;  %s1579_s18 = sphi %s1642_s18, %s2338_s18  }
   0xd   : > { %2312 = sst [smem:[#allocation17_spill]] %s1599_s23  ;;  %s88_s25 = sadd.s32 1, %s1587_s20 }
   0xe   : > { %p39_p0 = scmp.ge.s32.totalorder %s37_s24, 2  ;;  %p95_p1 = scmp.ne.s32.totalorder %s1587_s20, %s1583_s19 }
   0xf   : > { %p96_p2 = scmp.eq.s32.totalorder %s1599_s23, 0  ;;  %p1341_p5 = scmp.lt.s32.totalorder %s1599_s23, 2 }
  0x10   : > { %s2342_s24 = smov (%p39_p0, %s37_s24), 0  ;;  %s223_s27 = sand.u32 1, %s1599_s23  }
  0x11   : > { %2313 = sst [smem:[#allocation18_spill]] %s2342_s24  ;;  %p97_p3 = por %p96_p2, %p95_p1 }
  0x12   : > { %s85_s26 = ssub.s32 %s1595_s22, %s2342_s24  ;;  %s2295_s28 = sand.u32 1, %s1587_s20  }
  0x13   : > { %p86_p6 = scmp.eq.s32.totalorder %s85_s26, 0  ;;  %s1693_s30 = smul.u32 176, %s2295_s28 }
  0x14   : > { %s1696_s6 = sshll.u32 %s1595_s22, 7  ;;  %s2315_s2 = sld [smem:[#allocation21_spill]] }
  0x15   : > { %s1689_s29 = scalar_select %p86_p6, %s1587_s20, %s88_s25  }
  0x16   : > { %p1702_p7 = pnand %p1341_p5, %p97_p3  ;;  %s227_s11 = scalar_lea.vmem [#allocation6], %s1693_s30 }
  0x17   : > { %2314 = sst [smem:[#allocation19_spill]] %s1689_s29  ;;  %s234_s12 = sshll.u32 %s227_s11, 4  ;;  %s235_s12 = int_to_ptr.vmem [resolvable:$true] %s234_s12 }
  0x18   : > { %s1707_s13 = scalar_lea.sflag [#allocation7], %s223_s27  ;;  %p1403_p8 = pneg %p1702_p7 }
  0x19   : > { %s1414_s14 = scalar_lea.vmem %s235_s12, 2816  ;;  %s1601_s15 = smov [#allocation6]  }
  0x1a   : > { %s233_s9 = scalar_lea.hbm %s2315_s2, %s1696_s6  ;;  %p1415_p9 = scmp.ne.s32.totalorder %s235_s12, %s1414_s14 }
  0x1b   : > { %s1419_s16 = sshll.u32 %s1601_s15, 4  ;;  %s1420_s16 = int_to_ptr.vmem [resolvable:$false] %s1419_s16 }
  0x1c   : > { %p1417_p10 = pnand %p1415_p9, %p1403_p8  ;;  %s1421_s17 = scalar_lea.vmem %s1420_s16, 5632 }
  0x1d   : > { %p1422_p12 = scmp.lt.s32.totalorder %s235_s12, %s1420_s16  ;;  %p1423_p13 = scmp.lt.s32.totalorder %s1421_s17, %s1414_s14 }
  0x1e   : > { %p1418_p11 = pneg %p1417_p10 }
  0x1f   : > { %p1424_p0 = por %p1423_p13, %p1422_p12 }
  0x21   : > { %p1425_p2 = pnand %p1424_p0, %p1418_p11 }
  0x23   : > { %1428 = shalt.err (!%p1425_p2)
}
  0x24   : > { %s2296_s25 = smov 256   ;;  %s2298_s26 = smov 128  }
  0x25   : > { %s2300_s27 = smov 8   ;;  %s1721_s7 = sadd.s32 4294967295, %s1599_s23  }
  0x26   : > { %1329 = dma.hbm_to_vmem [thread:$0]  (!%p1702_p7), %s233_s9, 2816, %s235_s12, %s1707_s13, %s2296_s25, %s2298_s26, %s2300_s27  }
  0x27   : > { %s1223_s8 = sadd.s32 4294967294, %s1599_s23   ;;  %p101_p3 = scmp.ne.s32.totalorder %s1583_s19, %s1579_s18 }
  0x28   : > { %p2305_p5 = scmp.eq.s32.totalorder %s1721_s7, 0  ;;  %p181_p6 = scmp.eq.s32.totalorder %s1721_s7, 1 }
  0x29   : > { %p187_p9 = scmp.eq.s32.totalorder %s1223_s8, 1  ;;  %p1224_p11 = scmp.ge.s32.totalorder %s1599_s23, 1 }
  0x2a   : > { %p1730_p10 = por %p2305_p5, %p101_p3  ;;  %p1738_p12 = por %p181_p6, %p95_p1 }
  0x2b   : > { %p1742_p13 = por %p187_p9, %p101_p3  ;;  %p194_p0 = scmp.lt.s32.totalorder %s1599_s23, 3 }
  0x2c   : > { %s2318_s9 = scalar_select %p1738_p12, 1, 0 }
  0x2d   : > { %s2319_s12 = scalar_select %p1742_p13, 1, 0 }
  0x2e   : > { %p1747_p2 = pnand %p1224_p11, %p194_p0  ;;  %s1605_s15 = smov [#allocation3]  }
  0x2f   : > { %2320 = sst [smem:[#allocation20_spill]] %s2319_s12  ;;  %s206_s16 = sshll.u32 %s1605_s15, 4  ;;  %s1751_s16 = int_to_ptr.vmem [resolvable:$true] %s206_s16 }
  0x30   : > { %p1322_p4 = pneg %p1747_p2  ;;  %s2322_s3 = sld [smem:[#allocation22_spill]] }
  0x31   : > { %s248_s25 = scalar_lea.vmem [#allocation8], %s1693_s30  ;;  %s1606_s15 = smov [#allocation8]  }
  0x32   : > { %s255_s26 = sshll.u32 %s248_s25, 4  ;;  %p1762_p1 = pnand %p1322_p4, %p2305_p5  ;;  %s256_s26 = int_to_ptr.vmem [resolvable:$true] %s255_s26 }
  0x33   : > { %s1442_s2 = scalar_lea.vmem %s256_s26, 2816  ;;  %s1447_s24 = sshll.u32 %s1606_s15, 4  ;;  %s1448_s24 = int_to_ptr.vmem [resolvable:$false] %s1447_s24 }
  0x34   : > { %p1443_p3 = scmp.ne.s32.totalorder %s256_s26, %s1442_s2  ;;  %s1449_s22 = scalar_lea.vmem %s1448_s24, 5632 }
  0x35   : > { %p1450_p11 = scmp.lt.s32.totalorder %s256_s26, %s1448_s24  ;;  %p1451_p0 = scmp.lt.s32.totalorder %s1449_s22, %s1442_s2 }
  0x36   : > { %s254_s28 = scalar_lea.hbm %s2322_s3, %s1696_s6  ;;  %p1445_p6 = pnand %p1443_p3, %p1403_p8 }
  0x37   : > { %p1452_p13 = por %p1451_p0, %p1450_p11 }
  0x38   : > { %p1446_p9 = pneg %p1445_p6 }
  0x3a   : > { %p1453_p12 = pnand %p1452_p13, %p1446_p9 }
  0x3c   : > { %1456 = shalt.err (!%p1453_p12)
}
  0x3d   : > { %s2324_s25 = smov 8   ;;  %s2325_s17 = smov 128  }
  0x3e   : > { %s2326_s8 = smov 256   ;;  %p1459_p4 = pneg %p1762_p1 }
  0x3f   : > { %1332 = dma.hbm_to_vmem [thread:$0]  (!%p1702_p7), %s254_s28, 2816, %s256_s26, %s1707_s13, %s2326_s8, %s2325_s17, %s2324_s25  }
  0x40   : > { %s1468_s15 = scalar_lea.vmem %s1751_s16, 5632  ;;  %p1476_p13 = scmp.lt.s32.totalorder %s1751_s16, %s1751_s16 }
  0x41   : > { %p1469_p3 = scmp.ne.s32.totalorder %s1751_s16, %s1468_s15  ;;  %p1477_p12 = scmp.lt.s32.totalorder %s1468_s15, %s1468_s15 }
  0x43   : > { %p1471_p6 = pnand %p1469_p3, %p1459_p4  ;;  %p1478_p9 = por %p1477_p12, %p1476_p13 }
  0x45   : > { %p1472_p5 = pneg %p1471_p6 }
  0x47   : > { %p1479_p11 = pnand %p1478_p9, %p1472_p5 }
  0x49   : > { %1482 = shalt.err (!%p1479_p11)
}
  0x4a   : > { %s1607_s2 = smov 16   ;;  %s275_s26 = scalar_lea.hbm %s2293_s4, %s1696_s6 }
  0x4b   : > { %1325 = dma.hbm_to_vmem [thread:$0]  (!%p1762_p1), %s2289_s0, 5632, %s1751_s16, [#allocation4], %s2326_s8, %s2326_s8, %s1607_s2  }
  0x4c   : > { %s269_s15 = scalar_lea.vmem [#allocation9], %s1693_s30  ;;  %s2327_s29 = sand.u32 1, %s1587_s20  }
  0x4d   : > { %s276_s3 = sshll.u32 %s269_s15, 4  ;;  %s266_s27 = scalar_lea.sflag [#allocation10], %s2327_s29  ;;  %s277_s3 = int_to_ptr.vmem [resolvable:$true] %s276_s3 }
  0x4e   : > { %s1496_s23 = scalar_lea.vmem %s277_s3, 2816  ;;  %s1608_s22 = smov [#allocation9]  }
  0x4f   : > { %p1497_p5 = scmp.ne.s32.totalorder %s277_s3, %s1496_s23  ;;  %s1501_s24 = sshll.u32 %s1608_s22, 4  ;;  %s1502_s24 = int_to_ptr.vmem [resolvable:$false] %s1501_s24 }
  0x50   : > { %s1503_s12 = scalar_lea.vmem %s1502_s24, 5632  ;;  %p1504_p1 = scmp.lt.s32.totalorder %s277_s3, %s1502_s24 }
  0x51   : > { %p1499_p0 = pnand %p1497_p5, %p1403_p8  ;;  %p1505_p3 = scmp.lt.s32.totalorder %s1503_s12, %s1496_s23 }
  0x53   : > { %p1500_p4 = pneg %p1499_p0  ;;  %p1506_p6 = por %p1505_p3, %p1504_p1 }
  0x55   : > { %p1507_p13 = pnand %p1506_p6, %p1500_p4 }
  0x57   : > { %1510 = shalt.err (!%p1507_p13)
}
  0x58   : > { %1335 = dma.hbm_to_vmem [thread:$0]  (!%p1702_p7), %s275_s26, 2816, %s277_s3, %s266_s27, %s2326_s8, %s2325_s17, %s2324_s25  }
  0x59   : > { %288 = sbr.rel (%p1747_p2) target bundleno = 650 (0x28a), region = 40  ;;  %p2328_p8 = scmp.eq.s32.totalorder (!%p1747_p2), %s1721_s7, 0 }
  0x5e   : > { %1562 = dma.done.wait (%p2328_p8), [#allocation4], 5632   ;;  %p2329_p12 = pmov %p2328_p8 }
  0x5f   : > { %s294_s23 = sand.u32 1, %s1721_s7   ;;  %s1812_s29 = sand.u32 1, %s1583_s19  }
  0x60   : > { %1564 = vsyncadd (%p2329_p12), [#allocation4], 4294961664  ;;  %s1307_s30 = smul.u32 176, %s1812_s29  ;;  %s295_s6 = scalar_lea.sflag [#allocation7], %s294_s23 }
  0x62   : > { %s1815_s10 = scalar_lea.vmem [#allocation6], %s1307_s30 }
  0x63   : > { %1566 = dma.done.wait (%p1730_p10), %s295_s6, 5632  }
  0x64   : > { %1568 = vsyncadd (%p1730_p10), %s295_s6, 4294961664  ;;  %s1821_s3 = scalar_lea.vmem [#allocation8], %s1307_s30  ;;  %s313_s12 = scalar_lea.sflag [#allocation10], %s1812_s29 }
  0x65   : > { %s1824_s14 = scalar_lea.vmem [#allocation9], %s1307_s30 }
  0x66   : > { %1570 = dma.done.wait (%p1730_p10), %s313_s12, 2816  }
  0x67   : > { %1572 = vsyncadd (%p1730_p10), %s313_s12, 4294964480  ;;  %v1609_v0 = vmov 0.0   ;;  %v1610_v1 = vmov 0   ;;  %v1834_v2 = vld [vmem:[%s1815_s10 + $0x78] sm:$0xff]  ;;  %v1837_v3 = vld [vmem:[%s1815_s10 + $0x70] sm:$0xff]  ;;  %vm780_vm0 = vcmask 1040384  }
  0x68   : > { %784 = vmatprep.subr.mxu0 %v1609_v0  ;;  %360 = vst [vmem:[#allocation2] sm:$0x1] %v1609_v0  ;;  %1260 = vmatprep.subr.mxu1 %v1609_v0  ;;  %v1844_v4 = vld [vmem:[%s1815_s10 + $0x68] sm:$0xff]  ;;  %v1851_v5 = vld [vmem:[%s1815_s10 + $0x60] sm:$0xff]  ;;  %v1858_v6 = vld [vmem:[%s1815_s10 + $0x58] sm:$0xff]  ;;  %vm713_vm1 = vcmask 334848  }
  0x69   : > { %1399 = vset.pattern.permute.xlu0 %v1610_v1  ;;  %1400 = vset.pattern.permute.xlu1 %v1610_v1  ;;  %v1865_v7 = vld [vmem:[%s1815_s10 + $0x50] sm:$0xff]  ;;  %v1872_v8 = vld [vmem:[%s1815_s10 + $0x48] sm:$0xff]  ;;  %v1879_v9 = vld [vmem:[%s1815_s10 + $0x40] sm:$0xff]  ;;  %s1257_s28 = sshll.u32 %s1591_s21, 7  ;;  %s1073_s22 = scalar_lea.sflag [#allocation5], %s1812_s29 }
  0x6a   : > { %785 = vmatpush1.msra.mxu0 %v1834_v2  ;;  %1282 = vmatpush1.msra.mxu1 %v1834_v2  ;;  %v1886_v10 = vld [vmem:[%s1815_s10 + $0x38] sm:$0xff]  ;;  %v1893_v11 = vld [vmem:[%s1815_s10 + $0x30] sm:$0xff]  ;;  %v1900_v12 = vld [vmem:[%s1815_s10 + $0x28] sm:$0xff]  ;;  %s1084_s27 = scalar_lea.hbm %s2294_s5, %s1257_s28  ;;  %p2330_p10 = scmp.ne.s32.totalorder %s2318_s9, 0 }
  0x6b   : > { %786 = vmatprep.subr.mxu0 %v1609_v0  ;;  %1261 = vmatprep.subr.mxu1 %v1609_v0  ;;  %v1907_v13 = vld [vmem:[%s1815_s10 + $0x20] sm:$0xff]  ;;  %v1914_v14 = vld [vmem:[%s1815_s10 + $0x18] sm:$0xff]  ;;  %v1921_v15 = vld [vmem:[%s1815_s10 + $0x10] sm:$0xff]  ;;  %s1611_s23 = smov [#allocation11]  }
  0x6c   : > { %787 = vmatpush1.msra.mxu0 %v1837_v3  ;;  %1283 = vmatpush1.msra.mxu1 %v1837_v3  ;;  %v1928_v16 = vld [vmem:[%s1815_s10 + $0x8] sm:$0xff]  ;;  %v1935_v17 = vld [vmem:[%s1815_s10] sm:$0xff]  ;;  %v1958_v20 = vld [vmem:[%s1815_s10 + $0x98] sm:$0xff]  ;;  %s1515_s21 = sshll.u32 %s1611_s23, 4  ;;  %s1516_s21 = int_to_ptr.vmem [resolvable:$false] %s1515_s21 }
  0x6d   : > { %788 = vmatprep.subr.mxu0 %v1609_v0  ;;  %1262 = vmatprep.subr.mxu1 %v1609_v0  ;;  %v1942_v18 = vld [vmem:[%s1815_s10 + $0xa8] sm:$0x1]  ;;  %v1949_v19 = vld [vmem:[%s1815_s10 + $0xa0] sm:$0xff]  ;;  %v1965_v21 = vld [vmem:[%s1815_s10 + $0x90] sm:$0xff]  ;;  %s1517_s30 = scalar_lea.vmem %s1516_s21, 256 }
  0x6e   : > { %789 = vmatpush1.msra.mxu0 %v1844_v4  ;;  %1284 = vmatpush1.msra.mxu1 %v1844_v4  ;;  %v1972_v22 = vld [vmem:[%s1815_s10 + $0x88] sm:$0xff]  ;;  %v1979_v23 = vld [vmem:[%s1815_s10 + $0x80] sm:$0xff] }
  0x6f   : > { %790 = vmatprep.subr.mxu0 %v1609_v0  ;;  %1263 = vmatprep.subr.mxu1 %v1609_v0  ;;  %v406_v24 = vld [vmem:[#allocation3 + $0x8] sm:$0xff]  ;;  %v428_v25 = vld [vmem:[#allocation3 + $0xb8] sm:$0xff]  ;;  %v405_v26 = vld [vmem:[#allocation3] sm:$0xff] }
  0x70   : > { %791 = vmatpush1.msra.mxu0 %v1851_v5  ;;  %1285 = vmatpush1.msra.mxu1 %v1851_v5  ;;  %v427_v27 = vld [vmem:[#allocation3 + $0xb0] sm:$0xff]  ;;  %v408_v28 = vld [vmem:[#allocation3 + $0x18] sm:$0xff]  ;;  %v430_v29 = vld [vmem:[#allocation3 + $0xc8] sm:$0xff] }
  0x71   : > { %792 = vmatprep.subr.mxu0 %v1609_v0  ;;  %1264 = vmatprep.subr.mxu1 %v1609_v0  ;;  %v493_v30 = vld [vmem:[%s2290_s1] sm:$0xff]  ;;  %v495_v31 = vld [vmem:[%s2290_s1 + $0x10] sm:$0xff]  ;;  %v494_v36 = vld [vmem:[%s2290_s1 + $0x8] sm:$0xff] }
  0x72   : > { %793 = vmatpush1.msra.mxu0 %v1858_v6  ;;  %1286 = vmatpush1.msra.mxu1 %v1858_v6  ;;  %v407_v32 = vld [vmem:[#allocation3 + $0x10] sm:$0xff]  ;;  %v429_v33 = vld [vmem:[#allocation3 + $0xc0] sm:$0xff]  ;;  %v410_v34 = vld [vmem:[#allocation3 + $0x28] sm:$0xff] }
  0x73   : > { %794 = vmatprep.subr.mxu0 %v1609_v0  ;;  %1265 = vmatprep.subr.mxu1 %v1609_v0  ;;  %v432_v35 = vld [vmem:[#allocation3 + $0xd8] sm:$0xff]  ;;  %v409_v38 = vld [vmem:[#allocation3 + $0x20] sm:$0xff]  ;;  %v431_v39 = vld [vmem:[#allocation3 + $0xd0] sm:$0xff] }
  0x74   : > { %795 = vmatpush1.msra.mxu0 %v1865_v7  ;;  %1287 = vmatpush1.msra.mxu1 %v1865_v7  ;;  %v496_v37 = vld [vmem:[%s2290_s1 + $0x18] sm:$0xff]  ;;  %v434_v41 = vld [vmem:[#allocation3 + $0xe8] sm:$0xff]  ;;  %v497_v42 = vld [vmem:[%s2290_s1 + $0x20] sm:$0xff] }
  0x75   : > { %796 = vmatprep.subr.mxu0 %v1609_v0  ;;  %1266 = vmatprep.subr.mxu1 %v1609_v0  ;;  %v412_v40 = vld [vmem:[#allocation3 + $0x38] sm:$0xff]  ;;  %v498_v43 = vld [vmem:[%s2290_s1 + $0x28] sm:$0xff]  ;;  %v411_v44 = vld [vmem:[#allocation3 + $0x30] sm:$0xff] }
  0x76   : > { %797 = vmatpush1.msra.mxu0 %v1872_v8  ;;  %1288 = vmatpush1.msra.mxu1 %v1872_v8  ;;  %v433_v45 = vld [vmem:[#allocation3 + $0xe0] sm:$0xff]  ;;  %v414_v46 = vld [vmem:[#allocation3 + $0x48] sm:$0xff]  ;;  %v436_v47 = vld [vmem:[#allocation3 + $0xf8] sm:$0xff] }
  0x77   : > { %798 = vmatprep.subr.mxu0 %v1609_v0  ;;  %1267 = vmatprep.subr.mxu1 %v1609_v0  ;;  %v499_v48 = vld [vmem:[%s2290_s1 + $0x30] sm:$0xff]  ;;  %v500_v49 = vld [vmem:[%s2290_s1 + $0x38] sm:$0xff]  ;;  %v413_v50 = vld [vmem:[#allocation3 + $0x40] sm:$0xff] }
  0x78   : > { %799 = vmatpush1.msra.mxu0 %v1879_v9  ;;  %1289 = vmatpush1.msra.mxu1 %v1879_v9  ;;  %v435_v51 = vld [vmem:[#allocation3 + $0xf0] sm:$0xff]  ;;  %v416_v52 = vld [vmem:[#allocation3 + $0x58] sm:$0xff]  ;;  %v438_v53 = vld [vmem:[#allocation3 + $0x108] sm:$0xff] }
  0x79   : > { %800 = vmatprep.subr.mxu0 %v1609_v0  ;;  %1268 = vmatprep.subr.mxu1 %v1609_v0  ;;  %v501_v54 = vld [vmem:[%s2290_s1 + $0x40] sm:$0xff]  ;;  %v502_v55 = vld [vmem:[%s2290_s1 + $0x48] sm:$0xff]  ;;  %v415_v56 = vld [vmem:[#allocation3 + $0x50] sm:$0xff] }
  0x7a   : > { %801 = vmatpush1.msra.mxu0 %v1886_v10  ;;  %1290 = vmatpush1.msra.mxu1 %v1886_v10  ;;  %v437_v57 = vld [vmem:[#allocation3 + $0x100] sm:$0xff]  ;;  %v418_v58 = vld [vmem:[#allocation3 + $0x68] sm:$0xff]  ;;  %v440_v59 = vld [vmem:[#allocation3 + $0x118] sm:$0xff] }
  0x7b   : > { %802 = vmatprep.subr.mxu0 %v1609_v0  ;;  %1269 = vmatprep.subr.mxu1 %v1609_v0  ;;  %v503_v60 = vld [vmem:[%s2290_s1 + $0x50] sm:$0xff]  ;;  %v504_v61 = vld [vmem:[%s2290_s1 + $0x58] sm:$0xff]  ;;  %v417_v62 = vld [vmem:[#allocation3 + $0x60] sm:$0xff] }
  0x7c   : > { %803 = vmatpush1.msra.mxu0 %v1893_v11  ;;  %1291 = vmatpush1.msra.mxu1 %v1893_v11  ;;  %v439_v63 = vld [vmem:[#allocation3 + $0x110] sm:$0xff]  ;;  %v442_v1 = vld [vmem:[#allocation3 + $0x128] sm:$0xff] }
  0x7d   : > { %804 = vmatprep.subr.mxu0 %v1609_v0  ;;  %1270 = vmatprep.subr.mxu1 %v1609_v0 }
  0x7e   : > { %805 = vmatpush1.msra.mxu0 %v1900_v12  ;;  %1292 = vmatpush1.msra.mxu1 %v1900_v12 }
  0x7f   : > { %806 = vmatprep.subr.mxu0 %v1609_v0  ;;  %1271 = vmatprep.subr.mxu1 %v1609_v0 }
  0x80   : > { %807 = vmatpush1.msra.mxu0 %v1907_v13  ;;  %1293 = vmatpush1.msra.mxu1 %v1907_v13 }
  0x81   : > { %808 = vmatprep.subr.mxu0 %v1609_v0  ;;  %1272 = vmatprep.subr.mxu1 %v1609_v0 }
  0x82   : > { %809 = vmatpush1.msra.mxu0 %v1914_v14  ;;  %1294 = vmatpush1.msra.mxu1 %v1914_v14 }
  0x83   : > { %810 = vmatprep.subr.mxu0 %v1609_v0  ;;  %1273 = vmatprep.subr.mxu1 %v1609_v0 }
  0x84   : > { %811 = vmatpush1.msra.mxu0 %v1921_v15  ;;  %1295 = vmatpush1.msra.mxu1 %v1921_v15 }
  0x85   : > { %812 = vmatprep.subr.mxu0 %v1609_v0  ;;  %1274 = vmatprep.subr.mxu1 %v1609_v0 }
  0x86   : > { %813 = vmatpush1.msra.mxu0 %v1928_v16  ;;  %1296 = vmatpush1.msra.mxu1 %v1928_v16 }
  0x87   : > { %814 = vmatprep.subr.mxu0 %v1609_v0  ;;  %1275 = vmatprep.subr.mxu1 %v1609_v0 }
  0x88   : > { %815 = vmatpush1.msra.mxu0 %v1935_v17  ;;  %1297 = vmatpush1.msra.mxu1 %v1935_v17 }
  0x89   : > { %836 = vmatprep.subr.mxu0 %v1609_v0  ;;  %1276 = vmatprep.subr.mxu1 %v1609_v0 }
  0x8a   : > { %1233 = vmatpush2.msk.msra.mxu0 %vm780_vm0, %v1942_v18  ;;  %1298 = vmatpush2.msk.msra.mxu1 %vm780_vm0, %v1942_v18 }
  0x8b   : > { %838 = vmatprep.subr.mxu0 %v1609_v0  ;;  %1277 = vmatprep.subr.mxu1 %v1609_v0 }
  0x8c   : > { %839 = vmatpush2.msra.mxu0 %v1949_v19  ;;  %1299 = vmatpush2.msra.mxu1 %v1949_v19 }
  0x8d   : > { %840 = vmatprep.subr.mxu0 %v1609_v0  ;;  %1278 = vmatprep.subr.mxu1 %v1609_v0 }
  0x8e   : > { %841 = vmatpush2.msra.mxu0 %v1958_v20  ;;  %1300 = vmatpush2.msra.mxu1 %v1958_v20 }
  0x8f   : > { %842 = vmatprep.subr.mxu0 %v1609_v0  ;;  %1279 = vmatprep.subr.mxu1 %v1609_v0 }
  0x90   : > { %843 = vmatpush2.msra.mxu0 %v1965_v21  ;;  %1301 = vmatpush2.msra.mxu1 %v1965_v21 }
  0x91   : > { %844 = vmatprep.subr.mxu0 %v1609_v0  ;;  %1280 = vmatprep.subr.mxu1 %v1609_v0 }
  0x92   : > { %845 = vmatpush2.msra.mxu0 %v1972_v22  ;;  %1302 = vmatpush2.msra.mxu1 %v1972_v22 }
  0x93   : > { %846 = vmatprep.subr.mxu0 %v1609_v0  ;;  %1281 = vmatprep.subr.mxu1 %v1609_v0  ;;  %v420_v0 = vld [vmem:[#allocation3 + $0x78] sm:$0xff] }
  0x94   : > { %847 = vmatpush2.msra.mxu0 %v1979_v23  ;;  %1303 = vmatpush2.msra.mxu1 %v1979_v23 }
  0x95   : > { %1234 = vmatprep.mubr.msk.f32.mxu0 %vm713_vm1, %v406_v24  ;;  %1245 = vmatprep.mubr.msk.f32.mxu1 %vm713_vm1, %v428_v25  ;;  %v505_v24 = vld [vmem:[%s2290_s1 + $0x60] sm:$0xff]  ;;  %v506_v25 = vld [vmem:[%s2290_s1 + $0x68] sm:$0xff] }
  0x96   : > { %849 = vmatmul.mubr.f32.vlgmr.msra.gmra.mxu0 %v405_v26  ;;  %904 = vmatmul.mubr.f32.vlgmr.msra.gmra.mxu1 %v427_v27  ;;  %v419_v26 = vld [vmem:[#allocation3 + $0x70] sm:$0xff]  ;;  %v441_v27 = vld [vmem:[#allocation3 + $0x120] sm:$0xff] }
  0x97   : > { %1235 = vmatprep.mubr.msk.f32.mxu0 %vm713_vm1, %v408_v28  ;;  %1246 = vmatprep.mubr.msk.f32.mxu1 %vm713_vm1, %v430_v29  ;;  %v422_v28 = vld [vmem:[#allocation3 + $0x88] sm:$0xff]  ;;  %v444_v29 = vld [vmem:[#allocation3 + $0x138] sm:$0xff] }
  0x98   : > { %583 = vperm.xlu0 %1399, %v493_v30   ;;  %593 = vperm.xlu1 %1400, %v495_v31   ;;  %v507_v30 = vld [vmem:[%s2290_s1 + $0x70] sm:$0xff]  ;;  %v508_v31 = vld [vmem:[%s2290_s1 + $0x78] sm:$0xff] }
  0x9a   : > { %854 = vmatmul.mubr.f32.gmra.mxu0 %v407_v32  ;;  %909 = vmatmul.mubr.f32.gmra.mxu1 %v429_v33  ;;  %v421_v32 = vld [vmem:[#allocation3 + $0x80] sm:$0xff]  ;;  %v443_v33 = vld [vmem:[#allocation3 + $0x130] sm:$0xff] }
  0x9b   : > { %1236 = vmatprep.mubr.msk.f32.mxu0 %vm713_vm1, %v410_v34  ;;  %1247 = vmatprep.mubr.msk.f32.mxu1 %vm713_vm1, %v432_v35  ;;  %v424_v34 = vld [vmem:[#allocation3 + $0x98] sm:$0xff]  ;;  %v446_v35 = vld [vmem:[#allocation3 + $0x148] sm:$0xff] }
  0x9c   : > { %588 = vperm.xlu0 %1399, %v494_v36   ;;  %598 = vperm.xlu1 %1400, %v496_v37   ;;  %v509_v36 = vld [vmem:[%s2290_s1 + $0x80] sm:$0xff]  ;;  %v510_v37 = vld [vmem:[%s2290_s1 + $0x88] sm:$0xff] }
  0x9e   : > { %859 = vmatmul.mubr.f32.gmra.mxu0 %v409_v38  ;;  %914 = vmatmul.mubr.f32.gmra.mxu1 %v431_v39  ;;  %v423_v38 = vld [vmem:[#allocation3 + $0x90] sm:$0xff]  ;;  %v445_v39 = vld [vmem:[#allocation3 + $0x140] sm:$0xff] }
  0x9f   : > { %1237 = vmatprep.mubr.msk.f32.mxu0 %vm713_vm1, %v412_v40  ;;  %1248 = vmatprep.mubr.msk.f32.mxu1 %vm713_vm1, %v434_v41  ;;  %v426_v40 = vld [vmem:[#allocation3 + $0xa8] sm:$0xff]  ;;  %v448_v41 = vld [vmem:[#allocation3 + $0x158] sm:$0x1] }
  0xa0   : > { %603 = vperm.xlu0 %1399, %v497_v42   ;;  %608 = vperm.xlu1 %1400, %v498_v43   ;;  %v511_v42 = vld [vmem:[%s2290_s1 + $0x90] sm:$0xff]  ;;  %v512_v43 = vld [vmem:[%s2290_s1 + $0x98] sm:$0xff] }
  0xa2   : > { %864 = vmatmul.mubr.f32.gmra.mxu0 %v411_v44  ;;  %919 = vmatmul.mubr.f32.gmra.mxu1 %v433_v45  ;;  %v425_v44 = vld [vmem:[#allocation3 + $0xa0] sm:$0xff]  ;;  %v447_v45 = vld [vmem:[#allocation3 + $0x150] sm:$0x1] }
  0xa3   : > { %1238 = vmatprep.mubr.msk.f32.mxu0 %vm713_vm1, %v414_v46  ;;  %1249 = vmatprep.mubr.msk.f32.mxu1 %vm713_vm1, %v436_v47  ;;  %v513_v46 = vld [vmem:[%s2290_s1 + $0xa0] sm:$0xff]  ;;  %v514_v47 = vld [vmem:[%s2290_s1 + $0xa8] sm:$0x1] }
  0xa4   : > { %613 = vperm.xlu0 %1399, %v499_v48   ;;  %618 = vperm.xlu1 %1400, %v500_v49   ;;  %v383_v48 = vld [vmem:[%s1821_s3] sm:$0xff]  ;;  %v449_v49 = vmul.f32 %v1935_v17, %v1935_v17  ;;  %v386_v17 = vld [vmem:[%s1821_s3 + $0x18] sm:$0xff] }
  0xa6   : > { %869 = vmatmul.mubr.f32.gmra.mxu0 %v413_v50  ;;  %924 = vmatmul.mubr.f32.gmra.mxu1 %v435_v51  ;;  %v471_v50 = vmul.f32 %v383_v48, %v383_v48  ;;  %v384_v51 = vld [vmem:[%s1821_s3 + $0x8] sm:$0xff] }
  0xa7   : > { %1239 = vmatprep.mubr.msk.f32.mxu0 %vm713_vm1, %v416_v52  ;;  %1250 = vmatprep.mubr.msk.f32.mxu1 %vm713_vm1, %v438_v53  ;;  %v450_v52 = vmul.f32 %v1928_v16, %v1928_v16  ;;  %v515_v53 = vmul.f32 %v449_v49, %v449_v49 }
  0xa8   : > { %623 = vperm.xlu0 %1399, %v501_v54   ;;  %628 = vperm.xlu1 %1400, %v502_v55   ;;  %v537_v54 = vmul.f32 %v471_v50, %v471_v50  ;;  %v472_v55 = vmul.f32 %v384_v51, %v384_v51 }
  0xaa   : > { %874 = vmatmul.mubr.f32.gmra.mxu0 %v415_v56  ;;  %929 = vmatmul.mubr.f32.gmra.mxu1 %v437_v57  ;;  %v385_v56 = vld [vmem:[%s1821_s3 + $0x10] sm:$0xff] }
  0xab   : > { %1240 = vmatprep.mubr.msk.f32.mxu0 %vm713_vm1, %v418_v58  ;;  %1251 = vmatprep.mubr.msk.f32.mxu1 %vm713_vm1, %v440_v59  ;;  %v451_v59 = vmul.f32 %v1921_v15, %v1921_v15  ;;  %v453_v15 = vmul.f32 %v1907_v13, %v1907_v13 }
  0xac   : > { %633 = vperm.xlu0 %1399, %v503_v60   ;;  %638 = vperm.xlu1 %1400, %v504_v61   ;;  %v559_v60 = vsub.f32 %v515_v53, %v537_v54  ;;  %v473_v61 = vmul.f32 %v385_v56, %v385_v56 }
  0xad   : > { %v519_v13 = vmul.f32 %v453_v15, %v453_v15 }
  0xae   : > { %879 = vmatmul.mubr.f32.gmra.mxu0 %v417_v62  ;;  %934 = vmatmul.mubr.f32.gmra.mxu1 %v439_v63  ;;  %v516_v62 = vmul.f32 %v450_v52, %v450_v52  ;;  %v538_v63 = vmul.f32 %v472_v55, %v472_v55 }
  0xaf   : > { %1241 = vmatprep.mubr.msk.f32.mxu0 %vm713_vm1, %v420_v0  ;;  %1252 = vmatprep.mubr.msk.f32.mxu1 %vm713_vm1, %v442_v1  ;;  %v452_v0 = vmul.f32 %v1914_v14, %v1914_v14  ;;  %v517_v1 = vmul.f32 %v451_v59, %v451_v59  ;;  %v389_v59 = vld [vmem:[%s1821_s3 + $0x30] sm:$0xff] }
  0xb0   : > { %643 = vperm.xlu0 %1399, %v505_v24   ;;  %648 = vperm.xlu1 %1400, %v506_v25   ;;  %v539_v24 = vmul.f32 %v473_v61, %v473_v61  ;;  %v961_v61 = vld [vmem:[%s1824_s14 + $0x10] sm:$0xff] }
  0xb2   : > { %884 = vmatmul.mubr.f32.gmra.mxu0 %v419_v26  ;;  %939 = vmatmul.mubr.f32.gmra.mxu1 %v441_v27  ;;  %v560_v26 = vsub.f32 %v516_v62, %v538_v63  ;;  %v561_v14 = vsub.f32 %v517_v1, %v539_v24 }
  0xb3   : > { %1242 = vmatprep.mubr.msk.f32.mxu0 %vm713_vm1, %v422_v28  ;;  %1253 = vmatprep.mubr.msk.f32.mxu1 %vm713_vm1, %v444_v29  ;;  %v474_v28 = vmul.f32 %v386_v17, %v386_v17  ;;  %v387_v29 = vld [vmem:[%s1821_s3 + $0x20] sm:$0xff] }
  0xb4   : > { %653 = vperm.xlu0 %1399, %v507_v30   ;;  %658 = vperm.xlu1 %1400, %v508_v31   ;;  %v518_v30 = vmul.f32 %v452_v0, %v452_v0  ;;  %v475_v31 = vmul.f32 %v387_v29, %v387_v29  ;;  %v390_v29 = vld [vmem:[%s1821_s3 + $0x38] sm:$0xff] }
  0xb6   : > { %889 = vmatmul.mubr.f32.gmra.mxu0 %v421_v32  ;;  %944 = vmatmul.mubr.f32.gmra.mxu1 %v443_v33 }
  0xb7   : > { %1243 = vmatprep.mubr.msk.f32.mxu0 %vm713_vm1, %v424_v34  ;;  %1254 = vmatprep.mubr.msk.f32.mxu1 %vm713_vm1, %v446_v35  ;;  %v540_v35 = vmul.f32 %v474_v28, %v474_v28  ;;  %v477_v28 = vmul.f32 %v389_v59, %v389_v59 }
  0xb8   : > { %663 = vperm.xlu0 %1399, %v509_v36   ;;  %668 = vperm.xlu1 %1400, %v510_v37   ;;  %v388_v36 = vld [vmem:[%s1821_s3 + $0x28] sm:$0xff] }
  0xb9   : > { %v562_v50 = vsub.f32 %v518_v30, %v540_v35 }
  0xba   : > { %894 = vmatmul.mubr.f32.gmra.mxu0 %v423_v38  ;;  %949 = vmatmul.mubr.f32.gmra.mxu1 %v445_v39  ;;  %v959_v38 = vld [vmem:[%s1824_s14] sm:$0xff] }
  0xbb   : > { %1244 = vmatprep.mubr.msk.f32.mxu0 %vm713_vm1, %v426_v40  ;;  %1255 = vmatprep.mubr.msk.f32.mxu1 %vm713_vm1, %v448_v41 }
  0xbc   : > { %673 = vperm.xlu0 %1399, %v511_v42   ;;  %678 = vperm.xlu1 %1400, %v512_v43   ;;  %v454_v43 = vmul.f32 %v1900_v12, %v1900_v12 }
  0xbe   : > { %899 = vmatmul.mubr.f32.gmra.mxu0 %v425_v44  ;;  %954 = vmatmul.mubr.f32.gmra.mxu1 %v447_v45  ;;  %v541_v44 = vmul.f32 %v475_v31, %v475_v31  ;;  %v476_v45 = vmul.f32 %v388_v36, %v388_v36 }
  0xc0   : > { %683 = vperm.xlu0 %1399, %v513_v46   ;;  %688 = vperm.xlu1 %1400, %v514_v47   ;;  %v960_v47 = vld [vmem:[%s1824_s14 + $0x8] sm:$0xff]  ;;  %v563_v56 = vsub.f32 %v519_v13, %v541_v44  ;;  %v542_v12 = vmul.f32 %v476_v45, %v476_v45  ;;  %v391_v44 = vld [vmem:[%s1821_s3 + $0x40] sm:$0xff] }
 0x113   : > { %v584_v57 = vpop.permute.xlu0 %583  ;;  %v594_v58 = vpop.permute.xlu1 %593 }
 0x114   : > { %v691_v16 = vmul.f32 %v584_v57, %v559_v60  ;;  %v693_v49 = vmul.f32 %v594_v58, %v561_v14  ;;  %v520_v57 = vmul.f32 %v454_v43, %v454_v43  ;;  %v543_v43 = vmul.f32 %v477_v28, %v477_v28 }
 0x117   : > { %v589_v25 = vpop.permute.xlu0 %588  ;;  %v599_v27 = vpop.permute.xlu1 %598 }
 0x118   : > { %v692_v34 = vmul.f32 %v589_v25, %v560_v26  ;;  %v694_v63 = vmul.f32 %v599_v27, %v562_v50  ;;  %v455_v26 = vmul.f32 %v1893_v11, %v1893_v11 }
 0x11b   : > { %v604_v41 = vpop.permute.xlu0 %603  ;;  %v609_v42 = vpop.permute.xlu1 %608 }
 0x11c   : > { %v695_v14 = vmul.f32 %v604_v41, %v563_v56  ;;  %v479_v56 = vmul.f32 %v391_v44, %v391_v44 }
 0x11f   : > { %v2103_v17 = vpop.permute.xlu0 %613  ;;  %v2105_v58 = vpop.permute.xlu1 %618 }
 0x123   : > { %v2115_v13 = vpop.permute.xlu0 %623  ;;  %v2118_v45 = vpop.permute.xlu1 %628 }
 0x127   : > { %v2146_v28 = vpop.permute.xlu0 %633 }
 0x156   : > { %v850_v32 = vpop.f32.mrf.mxu0  ;;  %v2090_v33 = vpop.f32.mrf.mxu1 }
 0x157   : > { %v851_v37 = vadd.f32 %v850_v32, %v691_v16  ;;  %v962_v32 = vld [vmem:[%s1824_s14 + $0x18] sm:$0xff] }
 0x158   : > { %v852_v39 = vpop.f32.mrf.mxu0  ;;  %v907_v40 = vpop.f32.mrf.mxu1 }
 0x159   : > { %v981_v51 = vsub.f32 %v851_v37, %v959_v38  ;;  %v456_v37 = vmul.f32 %v1886_v10, %v1886_v10  ;;  %v478_v38 = vmul.f32 %v390_v29, %v390_v29  ;;  %v521_v40 = vmul.f32 %v455_v26, %v455_v26  ;;  %v393_v29 = vld [vmem:[%s1821_s3 + $0x50] sm:$0xff] }
 0x15a   : > { %v855_v46 = vpop.f32.mrf.mxu0  ;;  %v2097_v48 = vpop.f32.mrf.mxu1  ;;  %v481_v44 = vmul.f32 %v393_v29, %v393_v29  ;;  %v966_v29 = vld [vmem:[%s1824_s14 + $0x38] sm:$0xff] }
 0x15b   : > { %v856_v52 = vadd.f32 %v855_v46, %v692_v34  ;;  %v1004_v0 = vand.u32 2147483647, %v981_v51  ;;  %v564_v34 = vsub.f32 %v520_v57, %v542_v12  ;;  %v565_v59 = vsub.f32 %v521_v40, %v543_v43 }
 0x15c   : > { %v857_v53 = vpop.f32.mrf.mxu0  ;;  %v912_v54 = vpop.f32.mrf.mxu1  ;;  %v2158_v40 = vmul.f32 %v1949_v19, %v1949_v19  ;;  %v2162_v43 = vmul.f32 %v1958_v20, %v1958_v20 }
 0x15d   : > { %v982_v55 = vsub.f32 %v856_v52, %v960_v47  ;;  %v696_v51 = vmul.f32 %v609_v42, %v564_v34  ;;  %v457_v53 = vmul.f32 %v1879_v9, %v1879_v9  ;;  %v522_v54 = vmul.f32 %v456_v37, %v456_v37  ;;  %v395_v34 = vld [vmem:[%s1821_s3 + $0x60] sm:$0xff] }
 0x15e   : > { %v860_v60 = vpop.f32.mrf.mxu0  ;;  %v2101_v62 = vpop.f32.mrf.mxu1  ;;  %v2128_v42 = vmul.f32 %v1834_v2, %v1834_v2  ;;  %v462_v9 = vmul.f32 %v1844_v4, %v1844_v4  ;;  %v460_v2 = vmul.f32 %v1858_v6, %v1858_v6 }
 0x15f   : > { %v1005_v1 = vand.u32 2147483647, %v982_v55  ;;  %v861_v16 = vadd.f32 %v860_v60, %v693_v49  ;;  %v963_v49 = vld [vmem:[%s1824_s14 + $0x20] sm:$0xff]  ;;  %v544_v55 = vmul.f32 %v478_v38, %v478_v38  ;;  %v392_v60 = vld [vmem:[%s1821_s3 + $0x48] sm:$0xff]  ;;  %v2149_v4 = vpop.permute.xlu1 %638 }
 0x160   : > { %v862_v24 = vpop.f32.mrf.mxu0  ;;  %v917_v25 = vpop.f32.mrf.mxu1  ;;  %v526_v19 = vmul.f32 %v460_v2, %v460_v2 }
 0x161   : > { %v1026_v15 = vadd.f32 %v1005_v1, %v1004_v0  ;;  %v983_v30 = vsub.f32 %v861_v16, %v961_v61  ;;  %v2132_v0 = vmul.f32 %v1837_v3, %v1837_v3  ;;  %v461_v1 = vmul.f32 %v1851_v5, %v1851_v5  ;;  %v394_v16 = vld [vmem:[%s1821_s3 + $0x58] sm:$0xff]  ;;  %v964_v25 = vld [vmem:[%s1824_s14 + $0x28] sm:$0xff] }
 0x162   : > { %v865_v31 = vpop.f32.mrf.mxu0  ;;  %v2111_v27 = vpop.f32.mrf.mxu1  ;;  %v458_v3 = vmul.f32 %v1872_v8, %v1872_v8  ;;  %v482_v37 = vmul.f32 %v394_v16, %v394_v16  ;;  %v396_v8 = vld [vmem:[%s1821_s3 + $0x68] sm:$0xff]  ;;  %v2176_v16 = vmul.f32 %v1965_v21, %v1965_v21 }
 0x163   : > { %v1006_v35 = vand.u32 2147483647, %v983_v30  ;;  %v866_v36 = vadd.f32 %v865_v31, %v694_v63  ;;  %v566_v30 = vsub.f32 %v522_v54, %v544_v55  ;;  %v523_v31 = vmul.f32 %v457_v53, %v457_v53 }
 0x164   : > { %v867_v39 = vpop.f32.mrf.mxu0  ;;  %v922_v11 = vpop.f32.mrf.mxu1  ;;  %v484_v54 = vmul.f32 %v396_v8, %v396_v8  ;;  %v399_v8 = vld [vmem:[%s1821_s3 + $0x80] sm:$0xff] }
 0x165   : > { %v1027_v46 = vadd.f32 %v1026_v15, %v1006_v35  ;;  %v984_v41 = vsub.f32 %v866_v36, %v962_v32  ;;  %v545_v32 = vmul.f32 %v479_v56, %v479_v56  ;;  %v697_v36 = vmul.f32 %v2103_v17, %v565_v59  ;;  %v2171_v59 = vpop.permute.xlu1 %648 }
 0x166   : > { %v870_v47 = vpop.f32.mrf.mxu0  ;;  %v2121_v50 = vpop.f32.mrf.mxu1  ;;  %v459_v11 = vmul.f32 %v1865_v7, %v1865_v7  ;;  %v2167_v17 = vmul.f32 %v458_v3, %v458_v3  ;;  %v698_v56 = vmul.f32 %v2105_v58, %v566_v30  ;;  %v527_v58 = vmul.f32 %v461_v1, %v461_v1 }
 0x167   : > { %v1007_v52 = vand.u32 2147483647, %v984_v41  ;;  %v871_v10 = vadd.f32 %v870_v47, %v695_v14  ;;  %v480_v14 = vmul.f32 %v392_v60, %v392_v60  ;;  %v965_v41 = vld [vmem:[%s1824_s14 + $0x30] sm:$0xff]  ;;  %v398_v60 = vld [vmem:[%s1821_s3 + $0x78] sm:$0xff]  ;;  %v466_v1 = vmul.f32 %v1972_v22, %v1972_v22 }
 0x168   : > { %v872_v57 = vpop.f32.mrf.mxu0  ;;  %v927_v12 = vpop.f32.mrf.mxu1 }
 0x169   : > { %v1028_v61 = vadd.f32 %v1027_v46, %v1007_v52  ;;  %v985_v63 = vsub.f32 %v871_v10, %v963_v49  ;;  %v483_v49 = vmul.f32 %v395_v34, %v395_v34  ;;  %v567_v10 = vsub.f32 %v523_v31, %v545_v32  ;;  %v644_v12 = vpop.permute.xlu0 %643 }
 0x16a   : > { %v875_v24 = vpop.f32.mrf.mxu0  ;;  %v2140_v26 = vpop.f32.mrf.mxu1  ;;  %v546_v53 = vmul.f32 %v480_v14, %v480_v14  ;;  %v548_v57 = vmul.f32 %v482_v37, %v482_v37  ;;  %v528_v14 = vmul.f32 %v462_v9, %v462_v9  ;;  %v550_v34 = vmul.f32 %v484_v54, %v484_v54 }
 0x16b   : > { %v1008_v15 = vand.u32 2147483647, %v985_v63  ;;  %v876_v5 = vadd.f32 %v875_v24, %v696_v51  ;;  %v397_v51 = vld [vmem:[%s1821_s3 + $0x70] sm:$0xff]  ;;  %v525_v24 = vmul.f32 %v459_v11, %v459_v11  ;;  %v465_v11 = vmul.f32 %v1979_v23, %v1979_v23 }
 0x16c   : > { %v877_v35 = vpop.f32.mrf.mxu0  ;;  %v932_v6 = vpop.f32.mrf.mxu1  ;;  %v485_v2 = vmul.f32 %v397_v51, %v397_v51  ;;  %v568_v32 = vsub.f32 %v2167_v17, %v546_v53  ;;  %v570_v37 = vsub.f32 %v526_v19, %v548_v57  ;;  %v529_v9 = vmul.f32 %v2132_v0, %v2132_v0 }
 0x16d   : > { %v1029_v38 = vadd.f32 %v1028_v61, %v1008_v15  ;;  %v986_v39 = vsub.f32 %v876_v5, %v964_v25  ;;  %v547_v25 = vmul.f32 %v481_v44, %v481_v44  ;;  %v549_v5 = vmul.f32 %v483_v49, %v483_v49  ;;  %v654_v51 = vpop.permute.xlu0 %653 }
 0x16e   : > { %v880_v46 = vpop.f32.mrf.mxu0  ;;  %v2165_v47 = vpop.f32.mrf.mxu1  ;;  %v486_v35 = vmul.f32 %v398_v60, %v398_v60  ;;  %v551_v44 = vmul.f32 %v485_v2, %v485_v2  ;;  %v572_v19 = vsub.f32 %v528_v14, %v550_v34  ;;  %v530_v23 = vmul.f32 %v2128_v42, %v2128_v42 }
 0x16f   : > { %v1009_v52 = vand.u32 2147483647, %v986_v39  ;;  %v881_v7 = vadd.f32 %v880_v46, %v697_v36  ;;  %v699_v36 = vmul.f32 %v2115_v13, %v567_v10  ;;  %v569_v17 = vsub.f32 %v525_v24, %v547_v25  ;;  %v401_v10 = vld [vmem:[%s1821_s3 + $0x90] sm:$0xff] }
 0x170   : > { %v882_v55 = vpop.f32.mrf.mxu0  ;;  %v937_v20 = vpop.f32.mrf.mxu1  ;;  %v571_v49 = vsub.f32 %v527_v58, %v549_v5  ;;  %v552_v0 = vmul.f32 %v486_v35, %v486_v35  ;;  %v487_v54 = vmul.f32 %v399_v8, %v399_v8  ;;  %v700_v57 = vmul.f32 %v2118_v45, %v568_v32  ;;  %v968_v58 = vld [vmem:[%s1824_s14 + $0x48] sm:$0xff] }
 0x171   : > { %v1030_v61 = vadd.f32 %v1029_v38, %v1009_v52  ;;  %v987_v63 = vsub.f32 %v881_v7, %v965_v41  ;;  %v967_v41 = vld [vmem:[%s1824_s14 + $0x40] sm:$0xff]  ;;  %v659_v52 = vpop.permute.xlu1 %658  ;;  %v400_v7 = vld [vmem:[%s1821_s3 + $0x88] sm:$0xff]  ;;  %v702_v60 = vmul.f32 %v2149_v4, %v570_v37  ;;  %v573_v24 = vsub.f32 %v529_v9, %v551_v44  ;;  %v970_v9 = vld [vmem:[%s1824_s14 + $0x58] sm:$0xff] }
 0x172   : > { %v885_v3 = vpop.f32.mrf.mxu0  ;;  %v2179_v15 = vpop.f32.mrf.mxu1  ;;  %v403_v55 = vld [vmem:[%s1821_s3 + $0xa0] sm:$0xff]  ;;  %v531_v25 = vmul.f32 %v465_v11, %v465_v11  ;;  %v488_v2 = vmul.f32 %v400_v7, %v400_v7  ;;  %v703_v42 = vmul.f32 %v644_v12, %v571_v49  ;;  %v701_v45 = vmul.f32 %v2146_v28, %v569_v17 }
 0x173   : > { %v1010_v30 = vand.u32 2147483647, %v987_v63  ;;  %v886_v31 = vadd.f32 %v885_v3, %v698_v56  ;;  %v489_v3 = vmul.f32 %v401_v10, %v401_v10  ;;  %v574_v4 = vsub.f32 %v530_v23, %v552_v0  ;;  %v664_v12 = vpop.permute.xlu0 %663 }
 0x174   : > { %v887_v21 = vpop.f32.mrf.mxu0  ;;  %v942_v6 = vpop.f32.mrf.mxu1  ;;  %v553_v32 = vmul.f32 %v487_v54, %v487_v54  ;;  %v533_v35 = vmul.f32 %v2176_v16, %v2176_v16  ;;  %v704_v37 = vmul.f32 %v2171_v59, %v572_v19  ;;  %v532_v28 = vmul.f32 %v466_v1, %v466_v1  ;;  %v969_v16 = vld [vmem:[%s1824_s14 + $0x50] sm:$0xff] }
 0x175   : > { %v1031_v38 = vadd.f32 %v1030_v61, %v1010_v30  ;;  %v988_v39 = vsub.f32 %v886_v31, %v966_v29  ;;  %v402_v30 = vld [vmem:[%s1821_s3 + $0x98] sm:$0xff]  ;;  %v491_v31 = vmul.f32 %v403_v55, %v403_v55  ;;  %v669_v8 = vpop.permute.xlu1 %668  ;;  %v554_v44 = vmul.f32 %v488_v2, %v488_v2 }
 0x176   : > { %v890_v46 = vpop.f32.mrf.mxu0  ;;  %v2191_v13 = vpop.f32.mrf.mxu1  ;;  %v705_v7 = vmul.f32 %v654_v51, %v573_v24  ;;  %v575_v19 = vsub.f32 %v531_v25, %v553_v32  ;;  %v470_v23 = vmul.f32 %v1942_v18, %v1942_v18  ;;  %v972_v51 = vld [vmem:[%s1824_s14 + $0x68] sm:$0xff]  ;;  %v974_v32 = vld [vmem:[%s1824_s14 + $0x78] sm:$0xff] }
 0x177   : > { %v1011_v53 = vand.u32 2147483647, %v988_v39  ;;  %v891_v22 = vadd.f32 %v890_v46, %v699_v36  ;;  %v906_v36 = vadd.f32 %v2090_v33, %v702_v60  ;;  %v555_v46 = vmul.f32 %v489_v3, %v489_v3  ;;  %v674_v18 = vpop.permute.xlu0 %673 }
 0x178   : > { %v892_v20 = vpop.f32.mrf.mxu0  ;;  %v947_v56 = vpop.f32.mrf.mxu1  ;;  %v911_v33 = vadd.f32 %v2097_v48, %v703_v42  ;;  %v576_v60 = vsub.f32 %v532_v28, %v554_v44  ;;  %v534_v48 = vmul.f32 %v2162_v43, %v2162_v43  ;;  %v921_v24 = vadd.f32 %v2111_v27, %v705_v7  ;;  %v976_v44 = vld [vmem:[%s1824_s14 + $0x88] sm:$0xff] }
 0x179   : > { %v1032_v61 = vadd.f32 %v1031_v38, %v1011_v53  ;;  %v989_v63 = vsub.f32 %v891_v22, %v967_v41  ;;  %v404_v38 = vld [vmem:[%s1821_s3 + $0xa8] sm:$0x1]  ;;  %v490_v41 = vmul.f32 %v402_v30, %v402_v30  ;;  %v971_v53 = vld [vmem:[%s1824_s14 + $0x60] sm:$0xff]  ;;  %v706_v22 = vmul.f32 %v659_v52, %v574_v4  ;;  %v679_v25 = vpop.permute.xlu1 %678  ;;  %s1232_s3 = sshll.u32 %s1812_s29, 3 }
 0x17a   : > { %v895_v29 = vpop.f32.mrf.mxu0  ;;  %v2201_v5 = vpop.f32.mrf.mxu1  ;;  %v492_v1 = vmul.f32 %v404_v38, %v404_v38  ;;  %v992_v55 = vsub.f32 %v906_v36, %v970_v9  ;;  %v916_v20 = vadd.f32 %v2101_v62, %v704_v37  ;;  %v535_v52 = vmul.f32 %v2158_v40, %v2158_v40 }
 0x17b   : > { %v1012_v14 = vand.u32 2147483647, %v989_v63  ;;  %v896_v34 = vadd.f32 %v895_v29, %v700_v57  ;;  %v993_v63 = vsub.f32 %v911_v33, %v971_v53  ;;  %v557_v2 = vmul.f32 %v491_v31, %v491_v31  ;;  %v977_v33 = vld [vmem:[%s1824_s14 + $0x90] sm:$0xff] }
 0x17c   : > { %v897_v21 = vpop.f32.mrf.mxu0  ;;  %v952_v6 = vpop.f32.mrf.mxu1  ;;  %v707_v3 = vmul.f32 %v664_v12, %v575_v19  ;;  %v577_v29 = vsub.f32 %v533_v35, %v555_v46  ;;  %v536_v42 = vmul.f32 %v470_v23, %v470_v23  ;;  %v558_v30 = vmul.f32 %v492_v1, %v492_v1  ;;  %v975_v12 = vld [vmem:[%s1824_s14 + $0x80] sm:$0xff]  ;;  %v978_v19 = vld [vmem:[%s1824_s14 + $0x98] sm:$0xff] }
 0x17d   : > { %v1033_v39 = vadd.f32 %v1032_v61, %v1012_v14  ;;  %v990_v11 = vsub.f32 %v896_v34, %v968_v58  ;;  %v556_v61 = vmul.f32 %v490_v41, %v490_v41  ;;  %v973_v58 = vld [vmem:[%s1824_s14 + $0x70] sm:$0xff]  ;;  %v1015_v14 = vand.u32 2147483647, %v992_v55  ;;  %v689_v9 = vpop.permute.xlu1 %688  ;;  %v980_v55 = vld [vmem:[%s1824_s14 + $0xa8] sm:$0x1] }
 0x17e   : > { %v900_v17 = vpop.f32.mrf.mxu0  ;;  %v2212_v49 = vpop.f32.mrf.mxu1  ;;  %v994_v43 = vsub.f32 %v916_v20, %v972_v51  ;;  %v926_v34 = vadd.f32 %v2121_v50, %v706_v22  ;;  %v708_v40 = vmul.f32 %v669_v8, %v576_v60  ;;  %v1016_v21 = vand.u32 2147483647, %v993_v63 }
 0x17f   : > { %v1013_v59 = vand.u32 2147483647, %v990_v11  ;;  %v901_v10 = vadd.f32 %v900_v17, %v701_v45  ;;  %v578_v4 = vsub.f32 %v534_v48, %v556_v61  ;;  %v995_v27 = vsub.f32 %v921_v24, %v973_v58 }
 0x180   : > { %v902_v0 = vpop.f32.mrf.mxu0  ;;  %v957_v54 = vpop.f32.mrf.mxu1  ;;  %v931_v31 = vadd.f32 %v2140_v26, %v707_v3  ;;  %v709_v36 = vmul.f32 %v674_v18, %v577_v29  ;;  %v579_v35 = vsub.f32 %v535_v52, %v557_v2  ;;  %v580_v37 = vsub.f32 %v536_v42, %v558_v30  ;;  %v1003_v42 = vld [vmem:[#allocation2] sm:$0x1] }
 0x181   : > { %v1034_v56 = vadd.f32 %v1033_v39, %v1013_v59  ;;  %v991_v57 = vsub.f32 %v901_v10, %v969_v16  ;;  %v1017_v38 = vand.u32 2147483647, %v994_v43  ;;  %v684_v39 = vpop.permute.xlu0 %683  ;;  %v996_v11 = vsub.f32 %v926_v34, %v974_v32 }
 0x182   : > { %v936_v50 = vadd.f32 %v2165_v47, %v708_v40  ;;  %v710_v28 = vmul.f32 %v679_v25, %v578_v4  ;;  %v1018_v46 = vand.u32 2147483647, %v995_v27  ;;  %v997_v41 = vsub.f32 %v931_v31, %v975_v12 }
 0x183   : > { %v1014_v62 = vand.u32 2147483647, %v991_v57  ;;  %v941_v26 = vadd.f32 %v2179_v15, %v709_v36  ;;  %v711_v16 = vmul.f32 %v684_v39, %v579_v35  ;;  %v712_v7 = vmul.f32 %v689_v9, %v580_v37  ;;  %v979_v15 = vld [vmem:[%s1824_s14 + $0xa0] sm:$0xff]  ;;  %s352_s14 = scalar_lea.vmem [#allocation11], %s1232_s3 }
 0x184   : > { %v1019_v59 = vand.u32 2147483647, %v996_v11  ;;  %v998_v10 = vsub.f32 %v936_v50, %v976_v44  ;;  %v946_v53 = vadd.f32 %v2191_v13, %v710_v28  ;;  %v1020_v23 = vand.u32 2147483647, %v997_v41  ;;  %s1086_s2 = sshll.u32 %s352_s14, 4  ;;  %s2244_s2 = int_to_ptr.vmem [resolvable:$true] %s1086_s2 }
 0x185   : > { %v1035_v45 = vadd.f32 %v1034_v56, %v1014_v62  ;;  %v956_v47 = vadd.f32 %v2212_v49, %v712_v7  ;;  %v999_v1 = vsub.f32 %v941_v26, %v977_v33  ;;  %v951_v0 = vadd.f32 %v2201_v5, %v711_v16  ;;  %s1511_s24 = scalar_lea.vmem %s2244_s2, 128  ;;  %p1518_p11 = scmp.lt.s32.totalorder %s2244_s2, %s1516_s21 }
 0x186   : > { %v1021_v20 = vand.u32 2147483647, %v998_v10  ;;  %v1000_v56 = vsub.f32 %v946_v53, %v978_v19  ;;  %p1512_p7 = scmp.ne.s32.totalorder %s2244_s2, %s1511_s24  ;;  %p1519_p5 = scmp.lt.s32.totalorder %s1517_s30, %s1511_s24 }
 0x187   : > { %v1036_v6 = vadd.f32 %v1035_v45, %v1015_v14  ;;  %v1002_v51 = vsub.f32 %v956_v47, %v980_v55  ;;  %v1022_v60 = vand.u32 2147483647, %v999_v1  ;;  %v1001_v48 = vsub.f32 %v951_v0, %v979_v15 }
 0x188   : > { %v1023_v52 = vand.u32 2147483647, %v1000_v56  ;;  %p1513_p2 = pnand %p1512_p7, %p2330_p10  ;;  %p1520_p0 = por %p1519_p5, %p1518_p11 }
 0x189   : > { %v1037_v8 = vadd.f32 %v1036_v6, %v1016_v21  ;;  %v1025_v63 = vand.u32 2147483647, %v1002_v51  ;;  %v1024_v18 = vand.u32 2147483647, %v1001_v48 }
 0x18a   : > { %p1514_p9 = pneg %p1513_p2 }
 0x18b   : > { %v1038_v17 = vadd.f32 %v1037_v8, %v1017_v38  ;;  %v1046_v25 = vsel %vm780_vm0, %v1025_v63, 0.0 }
 0x18c   : > { %p1521_p4 = pnand %p1520_p0, %p1514_p9 }
 0x18d   : > { %v1039_v22 = vadd.f32 %v1038_v17, %v1018_v46 }
 0x18f   : > { %v1040_v54 = vadd.f32 %v1039_v22, %v1019_v59 }
 0x191   : > { %v1041_v57 = vadd.f32 %v1040_v54, %v1020_v23 }
 0x193   : > { %v1042_v61 = vadd.f32 %v1041_v57, %v1021_v20 }
 0x195   : > { %v1043_v13 = vadd.f32 %v1042_v61, %v1022_v60 }
 0x197   : > { %v1044_v24 = vadd.f32 %v1043_v13, %v1023_v52 }
 0x199   : > { %v1045_v49 = vadd.f32 %v1044_v24, %v1024_v18 }
 0x19b   : > { %v1047_v2 = vadd.f32 %v1046_v25, %v1045_v49 }
 0x19d   : > { %v1048_v5 = vrot.slane %v1047_v2, 4 }
 0x19f   : > { %v1049_v62 = vadd.f32 %v1048_v5, %v1047_v2 }
 0x1a1   : > { %v1050_v3 = vrot.slane %v1049_v62, 2 }
 0x1a3   : > { %v1051_v29 = vadd.f32 %v1050_v3, %v1049_v62 }
 0x1a5   : > { %v1052_v58 = vrot.slane %v1051_v29, 1 }
 0x1a7   : > { %v1053_v30 = vadd.f32 %v1052_v58, %v1051_v29 }
 0x1a9   : > { %v1054_v14 = vadd.f32 %v1053_v30, %v1003_v42 }
 0x1ab   : > { %1055 = vst [vmem:[#allocation2] sm:$0x1] %v1054_v14 }
 0x1b2   : > { %v1059_v43 = vld [vmem:[#allocation2] sm:$0x1] }
 0x1b3   : > { %v1060_v34 = vsel %vm780_vm0, %v1059_v43, 0.0 }
 0x1b4   : > { %1061 = vadd.xlane.f32.xlu0 %v1060_v34 }
 0x23d   : > { %v1062_v45 = vpop.xlane.xlu0 %1061 }
 0x23e   : > { %v1063_v40 = vrot.slane %v1062_v45, 4 }
 0x240   : > { %v1064_v4 = vadd.f32 %v1063_v40, %v1062_v45 }
 0x242   : > { %v1065_v32 = vrot.slane %v1064_v4, 2 }
 0x244   : > { %v1066_v21 = vadd.f32 %v1065_v32, %v1064_v4 }
 0x246   : > { %v1067_v27 = vrot.slane %v1066_v21, 1 }
 0x248   : > { %v1068_v31 = vadd.f32 %v1067_v27, %v1066_v21 }
 0x24a   : > { %1308 = vpush %v1068_v31 }
 0x27b   : > { %s1309_s13 = spop %1308 }
 0x27c   : > { %v1070_v6 = vstv %s1309_s13 }
 0x27d   : > { %1071 = vst [vmem:[%s352_s14] sm:$0xff] %v1070_v6 }
 0x27e   : > { %1524 = shalt.err (!%p1521_p4)
}
 0x27f   : > { %s1525_s6 = scalar_lea.hbm %s1084_s27, 128  ;;  %s1529_s12 = scalar_lea.hbm %s2294_s5, 256 }
 0x280   : > { %p1526_p1 = scmp.ne.s32.totalorder %s1084_s27, %s1525_s6  ;;  %p1530_p13 = scmp.lt.s32.totalorder %s1084_s27, %s2294_s5 }
 0x281   : > { %p1531_p8 = scmp.lt.s32.totalorder %s1529_s12, %s1525_s6 }
 0x282   : > { %p1527_p3 = pnand %p1526_p1, %p2330_p10 }
 0x283   : > { %p1532_p12 = por %p1531_p8, %p1530_p13 }
 0x284   : > { %p1528_p6 = pneg %p1527_p3 }
 0x286   : > { %p1533_p7 = pnand %p1532_p12, %p1528_p6 }
 0x288   : > { %1536 = shalt.err (!%p1533_p7)
}
 0x289   : > { %1320 = dma.vmem_to_hbm [thread:$0]  (%p2330_p10), %s2244_s2, 128, %s1084_s27, %s1073_s22  }
 0x28a PF: > { %s2331_s16 = sld [smem:[#allocation20_spill]]  ;;  %s1098_s17 = sand.u32 1, %s1579_s18  }
 0x28b   : > { %s2332_s25 = sld [smem:[#allocation17_spill]]  ;;  %s1099_s8 = scalar_lea.sflag [#allocation5], %s1098_s17 }
 0x290   : > { %p2333_p2 = scmp.ne.s32.totalorder %s2331_s16, 0 }
 0x291   : > { %p2334_p9 = scmp.ge.s32.totalorder %s2332_s25, 2 }
 0x293   : > { %p1337_p11 = pnand %p2334_p9, %p2333_p2 }
 0x295   : > { %p1338_p5 = pneg %p1337_p11 }
 0x297   : > { %1574 = dma.done.wait (%p1338_p5), %s1099_s8, 128  }
 0x298   : > { %1576 = vsyncadd (%p1338_p5), %s1099_s8, 4294967168  ;;  %s25_s23 = sadd.s32 1, %s2332_s25   ;;  %s2335_s9 = sld [smem:[#allocation19_spill]] }
 0x299   : > { %p22_p0 = scmp.ge.s32.totalorder %s25_s23, 4   ;;  %s2336_s21 = sld [smem:[#allocation16_spill]] }
 0x29a   : > { %s2337_s22 = sld [smem:[#allocation18_spill]]  ;;  %s2338_s18 = smov %s1583_s19 }
 0x29b   : > { %s2339_s19 = smov %s1587_s20  ;;  %24 = sbr.rel (!%p22_p0) target bundleno = 12 (0xc), region = 122 }
 0x29e   : > { %s2340_s20 = smov %s2335_s9 }
 0x2a0   :  { %1104 = vsyncpa [#allocation4], 1 }
 0x2a1   :  { %1106 = vsyncpa [#allocation4 + $0x1], 1 }
 0x2a2   :  { %1107 = vsyncpa [#allocation7], 1 }
 0x2a3   :  { %1109 = vsyncpa [#allocation7 + $0x1], 1 }
 0x2a4   :  { %1110 = vsyncpa [#allocation10], 1 }
 0x2a5   :  { %1112 = vsyncpa [#allocation10 + $0x1], 1 }
 0x2a6   :  { %1113 = vsyncpa [#allocation5], 1 }
 0x2a7   :  { %1115 = vsyncpa [#allocation5 + $0x1], 1 }

</bundles_post_ra>
